<compile_context>
chip_gen: v6e
topology: v6e:2x2x1
jax: 0.10.0
libtpu: 0.0.40
codegen_flags: <defaults>
</compile_context>

<pallas_src>
import functools
import math

import jax
import jax.numpy as jnp
from jax.experimental import pallas as pl
from jax.experimental.pallas import tpu as pltpu


_LANES = 128
_MAX_PACKED_LANES = 1024  # cap on lcm(N, 128) for the lane-dense packed path


@functools.lru_cache(maxsize=None)
def _physical_vmem_bytes() -> int:
    try:
        return int(pltpu.get_tpu_info().vmem_capacity_bytes)
    except Exception:
        return 128 * 1024 * 1024  # v5e / v6e per-TensorCore VMEM


def _pick_tiling(num_rows: int, lane_width: int, dtype_bytes: int):
    """Rows per block + vmem_limit_bytes. VMEM- and generation-aware."""
    phys = _physical_vmem_bytes()
    small_vmem = phys <= 96 * 1024 * 1024            # v7x: 64 MiB per TC
    target = (5 if small_vmem else 2) * 1024 * 1024  # bytes per input buffer
    min_steps = 4 if small_vmem else 2               # 2 TCs on v7x want >=4 blocks
    floor = max(8, 32 // dtype_bytes)                # 8 f32 / 16 bf16 / 32 int8

    row_bytes = lane_width * dtype_bytes
    # VMEM budget: 2 arrays (in + out) x 2 pipeline buffers, leave headroom.
    budget = int(phys * 0.55)
    tr_vmem = max(floor, (budget // (4 * row_bytes) // floor) * floor)
    tr = max(floor, (target // row_bytes // floor) * floor)
    tr = min(tr, tr_vmem)

    if num_rows <= floor:
        tr = num_rows                                # full extent: legal block
    elif tr >= num_rows:
        # Whole extent would fit one block: split so the pipeline (and on v7x
        # both TensorCores) has work to overlap.
        split = -(-num_rows // min_steps)            # cdiv
        split = ((split + floor - 1) // floor) * floor
        tr = min(num_rows, max(floor, min(tr, split)))

    needed = 4 * tr * row_bytes                      # in+out, double-buffered
    vmem_limit = max(32 * 1024 * 1024, needed + 8 * 1024 * 1024)
    vmem_limit = min(vmem_limit, phys - 16 * 1024 * 1024)
    return tr, int(vmem_limit)


def _packed_sum_kernel(x_ref, op2_ref, *, n, inv_scale):
    # Lane-dense path. x_ref: (TR, L) with L a multiple of 128; each super-row
    # packs G = L // n original rows of length n.  Two tiny MXU matmuls do the
    # segmented sum and the broadcast; the ones matrices are built in-kernel.
    x = x_ref[...]
    tr, L = x_ref.shape
    g = L // n

    lane = jax.lax.broadcasted_iota(jnp.int32, (L, g), 0)
    grp = jax.lax.broadcasted_iota(jnp.int32, (L, g), 1)
    lo = grp * n
    gather_ones = ((lane >= lo) & (lane < lo + n)).astype(x.dtype)      # (L, G)
    sums = jnp.dot(x, gather_ones, preferred_element_type=jnp.float32)  # (TR, G)
    if inv_scale != 1.0:
        sums = sums * jnp.float32(inv_scale)

    grp2 = jax.lax.broadcasted_iota(jnp.int32, (g, L), 0)
    lane2 = jax.lax.broadcasted_iota(jnp.int32, (g, L), 1)
    lo2 = grp2 * n
    scatter_ones = ((lane2 >= lo2) & (lane2 < lo2 + n)).astype(jnp.float32)  # (G, L)
    op2 = jnp.dot(sums, scatter_ones, preferred_element_type=jnp.float32)    # (TR, L)
    op2_ref[...] = op2.astype(op2_ref.dtype)


def _sum_bcast_kernel(x_ref, op2_ref, *, inv_scale):
    # General path. x_ref: (TR, N).  XLU lane-reduce with f32 accumulation
    # (no materialized full-tile upcast), scale the (TR, 1) column, broadcast.
    x = x_ref[...]
    s = jnp.sum(x, axis=-1, keepdims=True, dtype=jnp.float32)
    if inv_scale != 1.0:
        s = s * jnp.float32(inv_scale)
    op2_ref[...] = jnp.broadcast_to(s, x.shape).astype(op2_ref.dtype)


def ops1to1(x, normalization: str = "inf", normalization_val: float = 1.0):
    """Pallas equivalent of Ops1to1.forward. Returns [op1, op2] for x:(B,C,N)."""
    B, C, N = x.shape
    inv_scale = 1.0 / float(N) if normalization == "inf" else 1.0
    # NOTE: normalization_val is stored but unused in the PyTorch forward
    # (only 'inf' divides, and it divides by dim) -- kept for API parity.

    R = B * C
    dtype_bytes = jnp.dtype(x.dtype).itemsize
    op1 = x  # identity pass-through: no kernel write, no extra HBM copy

    use_packed = False
    L = _LANES
    if N % _LANES != 0 and jnp.issubdtype(x.dtype, jnp.floating):
        L = (N * _LANES) // math.gcd(N, _LANES)      # lcm(N, 128)
        use_packed = L <= _MAX_PACKED_LANES and (R * N) % L == 0

    if use_packed:
        # --- lane-dense packed path (e.g. N = 16, 24, 48, 96) ---
        Rp = (R * N) // L
        xp = x.reshape(Rp, L)                        # free row-major reshape
        tr, vmem_limit = _pick_tiling(Rp, L, dtype_bytes)
        kernel = functools.partial(_packed_sum_kernel, n=N, inv_scale=inv_scale)
        op2p = pl.pallas_call(
            kernel,
            out_shape=jax.ShapeDtypeStruct((Rp, L), x.dtype),
            grid=(pl.cdiv(Rp, tr),),
            in_specs=[pl.BlockSpec((tr, L), lambda i: (i, 0))],
            out_specs=pl.BlockSpec((tr, L), lambda i: (i, 0)),
            compiler_params=pltpu.CompilerParams(
                dimension_semantics=("parallel",),
                vmem_limit_bytes=vmem_limit),
        )(xp)
        op2 = op2p.reshape(B, C, N)
    else:
        # --- general path: block last dim == full N (satisfies tiling rule) ---
        x2d = x.reshape(R, N)
        tr, vmem_limit = _pick_tiling(R, N, dtype_bytes)
        kernel = functools.partial(_sum_bcast_kernel, inv_scale=inv_scale)
        op2_2d = pl.pallas_call(
            kernel,
            out_shape=jax.ShapeDtypeStruct((R, N), x.dtype),
            grid=(pl.cdiv(R, tr),),
            in_specs=[pl.BlockSpec((tr, N), lambda i: (i, 0))],
            out_specs=pl.BlockSpec((tr, N), lambda i: (i, 0)),
            compiler_params=pltpu.CompilerParams(
                dimension_semantics=("parallel",),
                vmem_limit_bytes=vmem_limit),
        )(x2d)
        op2 = op2_2d.reshape(B, C, N)

    return [op1, op2]


def _ops1to1_ref(x, normalization="inf"):
    # Pure-JAX reference mirroring the PyTorch forward.
    dim = x.shape[-1]
    sum_all = jnp.sum(x, axis=2, keepdims=True)
    op1 = x
    op2 = jnp.broadcast_to(sum_all, x.shape)
    if normalization == "inf":
        op2 = op2 / float(dim)
    return [op1, op2]


if __name__ == "__main__":
    key = jax.random.PRNGKey(0)
    k1, k2, k3, k4 = jax.random.split(key, 4)

    # 1) packed path, L = 128 (N divides 128): B=2, C=4, N=16
    x1 = jax.random.normal(k1, (2, 4, 16), dtype=jnp.float32)
    o1 = [jax.block_until_ready(o) for o in ops1to1(x1, "inf", 1.0)]
    r1 = _ops1to1_ref(x1)
    assert o1[0].shape == (2, 4, 16) and o1[1].shape == (2, 4, 16)
    assert jnp.allclose(o1[0], r1[0], atol=1e-6)
    assert jnp.allclose(o1[1], r1[1], atol=1e-5)

    # 2) packed path, L = lcm(24, 128) = 384 (non-divisor N, lane-dense via lcm)
    x2 = jax.random.normal(k2, (4, 8, 24), dtype=jnp.float32)
    o2 = [jax.block_until_ready(o) for o in ops1to1(x2, "inf", 1.0)]
    r2 = _ops1to1_ref(x2)
    assert jnp.allclose(o2[0], r2[0], atol=1e-6)
    assert jnp.allclose(o2[1], r2[1], atol=1e-5)

    # 3) general-path fallback (R*N=144 not a multiple of lcm(24,128)=384)
    x3 = jax.random.normal(k3, (2, 3, 24), dtype=jnp.float32)
    o3 = [jax.block_until_ready(o) for o in ops1to1(x3, "inf", 1.0)]
    r3 = _ops1to1_ref(x3)
    assert jnp.allclose(o3[0], r3[0], atol=1e-6)
    assert jnp.allclose(o3[1], r3[1], atol=1e-5)

    # 4) bf16 packed path (no f32 upcast before the MXU dot)
    x4 = jax.random.normal(k4, (2, 4, 16), dtype=jnp.float32).astype(jnp.bfloat16)
    o4 = [jax.block_until_ready(o) for o in ops1to1(x4, "inf", 1.0)]
    r4 = _ops1to1_ref(x4.astype(jnp.float32))
    assert o4[1].dtype == jnp.bfloat16
    assert jnp.allclose(o4[1].astype(jnp.float32), r4[1], atol=2e-2, rtol=2e-2)

    print("KERNEL_OK")
</pallas_src>

<mosaic_0001>
module attributes {stable_mosaic.version = 11 : i64} {
  func.func @_packed_sum_kernel(%arg0: i32, %arg1: memref<1x128xf32, #tpu.memory_space<vmem>>, %arg2: memref<1x128xf32, #tpu.memory_space<vmem>>) attributes {dimension_semantics = [#tpu.dimension_semantics<parallel>], iteration_bounds = array<i64: 1>, scalar_prefetch = 0 : i64, scratch_operands = 0 : i64, tpu.core_type = #tpu.core_type<tc>, window_params = [{transform_indices = @transform_0, window_bounds = array<i64: 1, 128>}, {transform_indices = @transform_1, window_bounds = array<i64: 1, 128>}]} {
    %c0 = arith.constant 0 : index
    %c0_0 = arith.constant 0 : index
    %0 = vector.load %arg1[%c0, %c0_0] : memref<1x128xf32, #tpu.memory_space<vmem>>, vector<1x128xf32>
    %1 = tpu.iota {dimensions = array<i32: 0>} : vector<128x8xi32>
    %2 = tpu.iota {dimensions = array<i32: 1>} : vector<128x8xi32>
    %c16_i32 = arith.constant 16 : i32
    %3 = vector.broadcast %c16_i32 : i32 to vector<128x8xi32>
    %4 = arith.muli %2, %3 : vector<128x8xi32>
    %5 = arith.cmpi sge, %1, %4 : vector<128x8xi32>
    %c16_i32_1 = arith.constant 16 : i32
    %6 = vector.broadcast %c16_i32_1 : i32 to vector<128x8xi32>
    %7 = arith.addi %4, %6 : vector<128x8xi32>
    %8 = arith.cmpi slt, %1, %7 : vector<128x8xi32>
    %9 = arith.andi %5, %8 : vector<128x8xi1>
    %10 = arith.extui %9 : vector<128x8xi1> to vector<128x8xi32>
    %11 = arith.sitofp %10 : vector<128x8xi32> to vector<128x8xf32>
    %cst = arith.constant dense<0.000000e+00> : vector<1x8xf32>
    %12 = tpu.matmul %0, %11, %cst {dimension_numbers = #tpu.dot_dimension_numbers<[1], [0], [0], [1], [0, 0, 1, 1], [], []>} : vector<1x128xf32>, vector<128x8xf32>, vector<1x8xf32> -> vector<1x8xf32>
    %cst_2 = arith.constant 6.250000e-02 : f32
    %13 = vector.broadcast %cst_2 : f32 to vector<1x8xf32>
    %14 = arith.mulf %12, %13 : vector<1x8xf32>
    %15 = tpu.iota {dimensions = array<i32: 0>} : vector<8x128xi32>
    %16 = tpu.iota {dimensions = array<i32: 1>} : vector<8x128xi32>
    %c16_i32_3 = arith.constant 16 : i32
    %17 = vector.broadcast %c16_i32_3 : i32 to vector<8x128xi32>
    %18 = arith.muli %15, %17 : vector<8x128xi32>
    %19 = arith.cmpi sge, %16, %18 : vector<8x128xi32>
    %c16_i32_4 = arith.constant 16 : i32
    %20 = vector.broadcast %c16_i32_4 : i32 to vector<8x128xi32>
    %21 = arith.addi %18, %20 : vector<8x128xi32>
    %22 = arith.cmpi slt, %16, %21 : vector<8x128xi32>
    %23 = arith.andi %19, %22 : vector<8x128xi1>
    %24 = arith.extui %23 : vector<8x128xi1> to vector<8x128xi32>
    %25 = arith.sitofp %24 : vector<8x128xi32> to vector<8x128xf32>
    %cst_5 = arith.constant dense<0.000000e+00> : vector<1x128xf32>
    %26 = tpu.matmul %14, %25, %cst_5 {dimension_numbers = #tpu.dot_dimension_numbers<[1], [0], [0], [1], [0, 0, 1, 1], [], []>} : vector<1x8xf32>, vector<8x128xf32>, vector<1x128xf32> -> vector<1x128xf32>
    %c0_6 = arith.constant 0 : index
    %c0_7 = arith.constant 0 : index
    %27 = vector.load %arg2[%c0_6, %c0_7] : memref<1x128xf32, #tpu.memory_space<vmem>>, vector<1x128xf32>
    tpu.vector_store %arg2[%c0_6, %c0_7], %26 {strides = array<i32>} : memref<1x128xf32, #tpu.memory_space<vmem>>, vector<1x128xf32>,
    return
  }
  func.func @transform_0(%arg0: i32) -> (i32, i32) {
    %c0_i32 = arith.constant 0 : i32
    %c0_i32_0 = arith.constant 0 : i32
    return %arg0, %c0_i32 : i32, i32
  }
  func.func @transform_1(%arg0: i32) -> (i32, i32) {
    %c0_i32 = arith.constant 0 : i32
    %c0_i32_0 = arith.constant 0 : i32
    return %arg0, %c0_i32 : i32, i32
  }
}

</mosaic_0001>

<bundles_post_ra>
// kernel: tpu_custom_call.1
= control target key start
LH: loop header
LB: loop body
LE: loop exit
PB: predicated region body
PF: predicated region fallthrough
CT: control target
= control target key end

     0   :  { %6 = vsyncpa [#allocation3], 0  ;;  %s553_s0 = inlined_call_operand.hbm [shape: f32[1,128], index: 0, kind: input, shape index: {}]   ;;  %s554_s1 = inlined_call_operand.hbm [shape: f32[1,128], index: 1, kind: output, shape index: {}]  }
   0x1   :  { %7 = vsyncpa [#allocation4], 0  ;;  %s434_s6 = smov [#allocation2]  }
   0x2   :  { %s14_s7 = sshll.u32 %s434_s6, 4  ;;  %s15_s7 = int_to_ptr.vmem [resolvable:$true] %s14_s7 }
   0x3   :  { %s398_s8 = scalar_lea.vmem %s15_s7, 16  ;;  %s402_s9 = scalar_lea.vmem %s15_s7, 32 }
   0x4   :  { %p399_p0 = scmp.ne.s32.totalorder %s15_s7, %s398_s8  ;;  %p403_p1 = scmp.lt.s32.totalorder %s15_s7, %s15_s7 }
   0x5   :  { %p404_p2 = scmp.lt.s32.totalorder %s402_s9, %s398_s8 }
   0x7   :  { %p405_p3 = por %p404_p2, %p403_p1 }
   0x9   :  { %p406_p4 = pnand %p405_p3, %p399_p0 }
   0xb   :  { %409 = shalt.err (!%p406_p4)
}
   0xc   :  { %17 = dma.hbm_to_vmem [thread:$0]  %s553_s0, 16, %s15_s7, [#allocation3]   ;;  %v22_v0 = vlaneseq }
   0xd   :  { %430 = dma.done.wait [#allocation3], 16  }
   0xe   :  { %431 = vsyncadd [#allocation3], 4294967280  ;;  %v435_v1 = vmov 0.0   ;;  %vm436_vm0 = vmmov 0   ;;  %v454_v2 = vshrl.u32 %v22_v0, 7  ;;  %v456_v3 = vand.u32 127, %v22_v0 }
   0xf   :  { %345 = vmatprep.subr.mxu0 %v435_v1  ;;  %377 = vmatprep.mubr.msk.f32.mxu0 %vm436_vm0, %v435_v1  ;;  %v437_v11 = vmov 1.0   ;;  %v21_v22 = vld [vmem:[#allocation2] sm:$0x1]  ;;  %s438_s0 = smov [#allocation5]  }
  0x10   :  { %380 = vmatprep.subr.mxu1 %v435_v1  ;;  %382 = vmatprep.mubr.msk.f32.mxu1 %vm436_vm0, %v435_v1  ;;  %v38_v4 = vadd.s32 120, %v454_v2  ;;  %v462_v5 = vmul.u32 16, %v456_v3  ;;  %v37_v6 = vadd.s32 112, %v454_v2  ;;  %v36_v7 = vadd.s32 104, %v454_v2  ;;  %s282_s12 = sshll.u32 %s438_s0, 4  ;;  %s283_s12 = int_to_ptr.vmem [resolvable:$true] %s282_s12 }
  0x11   :  { %v35_v9 = vadd.s32 96, %v454_v2  ;;  %v34_v10 = vadd.s32 88, %v454_v2  ;;  %v33_v12 = vadd.s32 80, %v454_v2  ;;  %v32_v13 = vadd.s32 72, %v454_v2  ;;  %s410_s13 = scalar_lea.vmem %s283_s12, 16  ;;  %s414_s14 = scalar_lea.vmem %s283_s12, 32 }
  0x12   :  { %vm57_vm1 = vcmp.ge.s32.totalorder %v38_v4, %v462_v5  ;;  %v468_v8 = vadd.s32 16, %v462_v5  ;;  %vm56_vm2 = vcmp.ge.s32.totalorder %v37_v6, %v462_v5  ;;  %vm55_vm5 = vcmp.ge.s32.totalorder %v36_v7, %v462_v5  ;;  %p411_p5 = scmp.ne.s32.totalorder %s283_s12, %s410_s13  ;;  %p415_p6 = scmp.lt.s32.totalorder %s283_s12, %s283_s12 }
  0x13   :  { %vm54_vm9 = vcmp.ge.s32.totalorder %v35_v9, %v462_v5  ;;  %vm53_vm12 = vcmp.ge.s32.totalorder %v34_v10, %v462_v5  ;;  %vm52_vm15 = vcmp.ge.s32.totalorder %v33_v12, %v462_v5  ;;  %v31_v14 = vadd.s32 64, %v454_v2  ;;  %p416_p7 = scmp.lt.s32.totalorder %s414_s14, %s410_s13 }
  0x14   :  { %vm74_vm3 = vcmp.lt.s32.totalorder %v38_v4, %v468_v8  ;;  %vm73_vm4 = vcmp.lt.s32.totalorder %v37_v6, %v468_v8  ;;  %vm72_vm6 = vcmp.lt.s32.totalorder %v36_v7, %v468_v8  ;;  %vm71_vm10 = vcmp.lt.s32.totalorder %v35_v9, %v468_v8 }
  0x15   :  { %vm90_vm7 = vmand %vm57_vm1, %vm74_vm3  ;;  %vm70_vm13 = vcmp.lt.s32.totalorder %v34_v10, %v468_v8  ;;  %vm69_vm0 = vcmp.lt.s32.totalorder %v33_v12, %v468_v8  ;;  %vm68_vm3 = vcmp.lt.s32.totalorder %v32_v13, %v468_v8  ;;  %v30_v15 = vadd.s32 56, %v454_v2  ;;  %p417_p8 = por %p416_p7, %p415_p6 }
  0x16   :  { %346 = vmatpush3.msk.msra.mxu0 %vm90_vm7, %v437_v11  ;;  %vm89_vm8 = vmand %vm56_vm2, %vm73_vm4  ;;  %vm51_vm2 = vcmp.ge.s32.totalorder %v32_v13, %v462_v5  ;;  %v29_v16 = vadd.s32 48, %v454_v2  ;;  %v28_v17 = vadd.s32 40, %v454_v2  ;;  %v27_v18 = vadd.s32 32, %v454_v2 }
  0x17   :  { %347 = vmatprep.subr.mxu0 %v435_v1  ;;  %vm88_vm11 = vmand %vm55_vm5, %vm72_vm6  ;;  %vm50_vm5 = vcmp.ge.s32.totalorder %v31_v14, %v462_v5  ;;  %vm67_vm6 = vcmp.lt.s32.totalorder %v31_v14, %v468_v8  ;;  %v26_v19 = vadd.s32 24, %v454_v2  ;;  %v25_v20 = vadd.s32 16, %v454_v2  ;;  %p418_p9 = pnand %p417_p8, %p411_p5 }
  0x18   :  { %348 = vmatpush3.msk.msra.mxu0 %vm89_vm8, %v437_v11  ;;  %vm87_vm14 = vmand %vm54_vm9, %vm71_vm10  ;;  %vm49_vm8 = vcmp.ge.s32.totalorder %v30_v15, %v462_v5  ;;  %vm66_vm9 = vcmp.lt.s32.totalorder %v30_v15, %v468_v8  ;;  %v24_v21 = vadd.s32 8, %v454_v2  ;;  %v194_v23 = vmul.u32 16, %v454_v2 }
  0x19   :  { %349 = vmatprep.subr.mxu0 %v435_v1  ;;  %vm86_vm1 = vmand %vm53_vm12, %vm70_vm13  ;;  %vm65_vm12 = vcmp.lt.s32.totalorder %v29_v16, %v468_v8 }
  0x1a   :  { %350 = vmatpush3.msk.msra.mxu0 %vm88_vm11, %v437_v11  ;;  %vm85_vm4 = vmand %vm52_vm15, %vm69_vm0  ;;  %vm48_vm11 = vcmp.ge.s32.totalorder %v29_v16, %v462_v5  ;;  %vm64_vm15 = vcmp.lt.s32.totalorder %v28_v17, %v468_v8  ;;  %v196_v24 = vadd.s32 16, %v194_v23 }
  0x1b   :  { %351 = vmatprep.subr.mxu0 %v435_v1  ;;  %vm84_vm7 = vmand %vm51_vm2, %vm68_vm3  ;;  %vm63_vm2 = vcmp.lt.s32.totalorder %v27_v18, %v468_v8 }
  0x1c   :  { %352 = vmatpush3.msk.msra.mxu0 %vm87_vm14, %v437_v11  ;;  %vm83_vm10 = vmand %vm50_vm5, %vm67_vm6  ;;  %vm47_vm14 = vcmp.ge.s32.totalorder %v28_v17, %v462_v5  ;;  %vm62_vm5 = vcmp.lt.s32.totalorder %v26_v19, %v468_v8 }
  0x1d   :  { %353 = vmatprep.subr.mxu0 %v435_v1  ;;  %vm82_vm13 = vmand %vm49_vm8, %vm66_vm9  ;;  %vm61_vm8 = vcmp.lt.s32.totalorder %v25_v20, %v468_v8 }
  0x1e   :  { %354 = vmatpush3.msk.msra.mxu0 %vm86_vm1, %v437_v11  ;;  %vm81_vm0 = vmand %vm48_vm11, %vm65_vm12  ;;  %vm46_vm1 = vcmp.ge.s32.totalorder %v27_v18, %v462_v5  ;;  %vm60_vm11 = vcmp.lt.s32.totalorder %v24_v21, %v468_v8 }
  0x1f   :  { %355 = vmatprep.subr.mxu0 %v435_v1  ;;  %vm80_vm3 = vmand %vm47_vm14, %vm64_vm15  ;;  %vm59_vm14 = vcmp.lt.s32.totalorder %v454_v2, %v468_v8 }
  0x20   :  { %356 = vmatpush3.msk.msra.mxu0 %vm85_vm4, %v437_v11  ;;  %vm45_vm4 = vcmp.ge.s32.totalorder %v26_v19, %v462_v5  ;;  %vm79_vm6 = vmand %vm46_vm1, %vm63_vm2  ;;  %vm195_vm1 = vcmp.ge.s32.totalorder %v456_v3, %v194_v23  ;;  %vm197_vm2 = vcmp.lt.s32.totalorder %v456_v3, %v196_v24 }
  0x21   :  { %357 = vmatprep.subr.mxu0 %v435_v1  ;;  %vm78_vm9 = vmand %vm45_vm4, %vm62_vm5  ;;  %vm201_vm4 = vcmask 64512  }
  0x22   :  { %358 = vmatpush3.msk.msra.mxu0 %vm84_vm7, %v437_v11  ;;  %vm44_vm7 = vcmp.ge.s32.totalorder %v25_v20, %v462_v5 }
  0x23   :  { %359 = vmatprep.subr.mxu0 %v435_v1  ;;  %vm77_vm12 = vmand %vm44_vm7, %vm61_vm8 }
  0x24   :  { %360 = vmatpush3.msk.msra.mxu0 %vm83_vm10, %v437_v11  ;;  %vm43_vm10 = vcmp.ge.s32.totalorder %v24_v21, %v462_v5 }
  0x25   :  { %361 = vmatprep.subr.mxu0 %v435_v1  ;;  %vm76_vm15 = vmand %vm43_vm10, %vm60_vm11 }
  0x26   :  { %362 = vmatpush3.msk.msra.mxu0 %vm82_vm13, %v437_v11  ;;  %vm42_vm13 = vcmp.ge.s32.totalorder %v454_v2, %v462_v5 }
  0x27   :  { %363 = vmatprep.subr.mxu0 %v435_v1 }
  0x28   :  { %364 = vmatpush3.msk.msra.mxu0 %vm81_vm0, %v437_v11  ;;  %vm75_vm0 = vmand %vm42_vm13, %vm59_vm14 }
  0x29   :  { %365 = vmatprep.subr.mxu0 %v435_v1 }
  0x2a   :  { %366 = vmatpush3.msk.msra.mxu0 %vm80_vm3, %v437_v11  ;;  %vm198_vm3 = vmand %vm195_vm1, %vm197_vm2 }
  0x2b   :  { %367 = vmatprep.subr.mxu0 %v435_v1  ;;  %381 = vmatpush3.msk.msra.mxu1 %vm198_vm3, %v437_v11 }
  0x2c   :  { %368 = vmatpush3.msk.msra.mxu0 %vm79_vm6, %v437_v11 }
  0x2d   :  { %369 = vmatprep.subr.mxu0 %v435_v1 }
  0x2e   :  { %370 = vmatpush3.msk.msra.mxu0 %vm78_vm9, %v437_v11 }
  0x2f   :  { %371 = vmatprep.subr.mxu0 %v435_v1 }
  0x30   :  { %372 = vmatpush3.msk.msra.mxu0 %vm77_vm12, %v437_v11 }
  0x31   :  { %373 = vmatprep.subr.mxu0 %v435_v1 }
  0x32   :  { %374 = vmatpush3.msk.msra.mxu0 %vm76_vm15, %v437_v11 }
  0x33   :  { %375 = vmatprep.subr.mxu0 %v435_v1 }
  0x34   :  { %376 = vmatpush3.msk.msra.mxu0 %vm75_vm0, %v437_v11 }
  0x35   :  { %378 = vmatmul.mubr.f32.vlgmr.msra.gmra.mxu0 %v21_v22 }
  0xf5   :  { %v189_v25 = vpop.f32.mrf.mxu0 }
  0xf6   :  { %v193_v26 = vmul.f32 0.0625, %v189_v25 }
  0xf7   :  { %v379_v27 = vpop.f32.mrf.mxu0 }
  0xf8   :  { %383 = vmatmul.mubr.msk.f32.vlgmr.msra.gmra.mxu1 %vm201_vm4, %v193_v26 }
 0x1b8   :  { %v271_v28 = vpop.f32.mrf.mxu1 }
 0x1b9   :  { %275 = vst [vmem:[#allocation5] sm:$0x1] %v271_v28 }
 0x1ba   :  { %v384_v29 = vpop.f32.mrf.mxu1 }
 0x1bb   :  { %421 = shalt.err (!%p418_p9)
}
 0x1bc   :  { %285 = dma.vmem_to_hbm [thread:$0]  %s283_s12, 16, %s554_s1, [#allocation4]  }
 0x1bd   :  { %432 = dma.done.wait [#allocation4], 16  }
 0x1be   :  { %433 = vsyncadd [#allocation4], 4294967280 }
 0x1bf   :  { %289 = vsyncpa [#allocation3], 1 }
 0x1c0   :  { %290 = vsyncpa [#allocation4], 1 }

</bundles_post_ra>
